<compile_context>
chip_gen: v6e
topology: v6e:2x2x1
jax: 0.10.0
libtpu: 0.0.40
codegen_flags: <defaults>
</compile_context>

<pallas_src>
import jax
import jax.numpy as jnp
from jax.experimental import pallas as pl
from jax.experimental.pallas import tpu as pltpu

B = 2                # batch
L = 16               # input sequence length
C0, C1, C2, C3 = 1, 16, 64, 128
K = 2                # conv kernel size
EPS = 1e-5
NUM_CLASSES = 8

# Derived lengths through the network.
L1 = L - 1           # 15  conv1 output length
P1 = L1 // 2         # 7   pool1 output length
L2 = P1 - 1          # 6
P2 = L2 // 2         # 3
L3 = P2 - 1          # 2
P3 = L3 // 2         # 1   -> flatten = 1 * 128 = 128

# Row layout of the packed per-channel parameter slab (8, 128), zero padded:
#   row 0: gamma1 (16)   row 1: beta1 (16)
#   row 2: gamma2 (64)   row 3: beta2 (64)
#   row 4: gamma3 (128)  row 5: beta3 (128)
#   row 6: fc bias (8)
#   row 7: conv1 weight, tap0 in lanes [0:16), tap1 in lanes [16:32)


def cnn1d_kernel(xb_ref, w2_ref, w3_ref, wfc_ref, pp_ref, out_ref):
    """Whole forward pass; 5 untiled VMEM inputs, intermediates live in vregs."""
    pp = pp_ref[...]                                   # (8, 128) packed params

    def bn_relu(acc, g, be):
        # acc: (..., C) f32. Training-mode BN over all leading axes, fused ReLU,
        # affine folded into a single FMA.  Biased (population) variance.
        n = 1
        for d in acc.shape[:-1]:
            n *= d
        inv_n = 1.0 / float(n)
        s1 = acc
        s2 = acc * acc
        for _ in range(acc.ndim - 1):                  # nested single-axis sums
            s1 = jnp.sum(s1, axis=0)
            s2 = jnp.sum(s2, axis=0)
        mean = s1 * inv_n
        var = s2 * inv_n - mean * mean                 # one-pass biased variance
        scale = g * jax.lax.rsqrt(var + EPS)           # EUP
        shift = be - mean * scale
        return jnp.maximum(acc * scale + shift, 0.0)   # single FMA + ReLU

    # ---- Layer 1: Conv1d(1 -> 16, k=2) on the pre-broadcast (B, L, 16) input.
    #      Pure VPU (degenerate contraction of size 2); conv bias folded away by BN.
    xb = xb_ref[...]                                   # (B, 16, 16)
    w1_t0 = pp[7, :C1]                                 # (16,)
    w1_t1 = pp[7, C1:2 * C1]                           # (16,)
    acc1 = xb[:, :L1, :] * w1_t0 + xb[:, 1:, :] * w1_t1        # (B, 15, 16)
    y1 = bn_relu(acc1, pp[0, :C1], pp[1, :C1])                 # (B, 15, 16)
    y1p = y1[:, :2 * P1, :].reshape(B, P1, 2, C1)              # drop trailing row
    h1 = jnp.maximum(y1p[:, :, 0, :], y1p[:, :, 1, :])         # (B, 7, 16)

    # ---- Layer 2: Conv1d(16 -> 64, k=2): one unbatched 2-D MXU matmul.
    taps2 = jnp.concatenate([h1[:, :L2, :], h1[:, 1:, :]], axis=-1)   # (B, 6, 32)
    acc2 = jnp.dot(taps2.reshape(B * L2, 2 * C1), w2_ref[...],
                   preferred_element_type=jnp.float32)                 # (12, 64)
    y2 = bn_relu(acc2, pp[2, :C2], pp[3, :C2])                         # (12, 64)
    y2p = y2.reshape(B, P2, 2, C2)                                     # L2 even: no drop
    h2 = jnp.maximum(y2p[:, :, 0, :], y2p[:, :, 1, :])                 # (B, 3, 64)

    # ---- Layer 3: Conv1d(64 -> 128, k=2): one unbatched 2-D MXU matmul.
    taps3 = jnp.concatenate([h2[:, :L3, :], h2[:, 1:, :]], axis=-1)    # (B, 2, 128)
    acc3 = jnp.dot(taps3.reshape(B * L3, 2 * C2), w3_ref[...],
                   preferred_element_type=jnp.float32)                 # (4, 128)
    y3 = bn_relu(acc3, pp[4, :C3], pp[5, :C3])                         # (4, 128)
    y3p = y3.reshape(B, L3, C3)
    flat = jnp.maximum(y3p[:, 0, :], y3p[:, 1, :])                     # pool+flatten (B, 128)

    # ---- Linear(128 -> 8): one matmul, one store.
    out_ref[...] = (jnp.dot(flat, wfc_ref[...], preferred_element_type=jnp.float32)
                    + pp[6, :NUM_CLASSES])


def cnn1d_forward(x_ncl, params):
    """x_ncl: (B, 1, L) float32, PyTorch NCL layout."""
    x = jnp.transpose(x_ncl, (0, 2, 1)).astype(jnp.float32)        # (B, L, 1)
    # Pre-broadcast the single input channel to C1 lanes (layer-1 is then a
    # lane-dense VPU multiply inside the kernel).  ~2 KB, done once in XLA.
    xb = jnp.broadcast_to(x, (B, L, C1))

    # Pack all sub-tile parameters into one (8, 128) slab -> one aligned DMA.
    w1 = params['w1'].reshape(K * C0, C1).astype(jnp.float32)      # (2, 16)
    pp = jnp.zeros((8, 128), jnp.float32)
    pp = pp.at[0, :C1].set(params['g1'])
    pp = pp.at[1, :C1].set(params['be1'])
    pp = pp.at[2, :C2].set(params['g2'])
    pp = pp.at[3, :C2].set(params['be2'])
    pp = pp.at[4, :C3].set(params['g3'])
    pp = pp.at[5, :C3].set(params['be3'])
    pp = pp.at[6, :NUM_CLASSES].set(params['bfc'])
    pp = pp.at[7, :C1].set(w1[0])
    pp = pp.at[7, C1:2 * C1].set(w1[1])

    # Conv biases b1/b2/b3 are intentionally NOT passed: training-mode BN
    # subtracts the batch mean, so a per-channel pre-BN bias cancels exactly.
    inputs = (xb,
              params['w2'].reshape(K * C1, C2).astype(jnp.float32),   # (32, 64)
              params['w3'].reshape(K * C2, C3).astype(jnp.float32),   # (128, 128)
              params['wfc'].astype(jnp.float32),                      # (128, 8)
              pp)

    vmem = pl.BlockSpec(memory_space=pltpu.MemorySpace.VMEM)
    return pl.pallas_call(
        cnn1d_kernel,
        out_shape=jax.ShapeDtypeStruct((B, NUM_CLASSES), jnp.float32),
        in_specs=[vmem] * len(inputs),
        out_specs=vmem,
    )(*inputs)


def cnn1d_reference(x_ncl, params):
    """Pure-JAX reference (no Pallas) with identical semantics (keeps conv biases)."""
    h = jnp.transpose(x_ncl, (0, 2, 1)).astype(jnp.float32)        # (B, L, 1)
    for i in (1, 2, 3):
        w, b = params[f'w{i}'], params[f'b{i}']
        g, be = params[f'g{i}'], params[f'be{i}']
        l_out = h.shape[1] - 1
        acc = (jnp.einsum('blc,cd->bld', h[:, :l_out, :], w[0])
               + jnp.einsum('blc,cd->bld', h[:, 1:1 + l_out, :], w[1]) + b)
        mean = acc.mean(axis=(0, 1))
        var = jnp.square(acc - mean).mean(axis=(0, 1))
        y = jnp.maximum((acc - mean) * (g / jnp.sqrt(var + EPS)) + be, 0.0)
        lp = l_out // 2
        h = y[:, :2 * lp, :].reshape(y.shape[0], lp, 2, -1).max(axis=2)
    flat = h.reshape(h.shape[0], -1)
    return flat @ params['wfc'] + params['bfc']


def init_params(key):
    ks = jax.random.split(key, 14)

    def conv_w(k, cin, cout):
        std = 1.0 / float(cin * K) ** 0.5
        return std * jax.random.normal(k, (K, cin, cout), jnp.float32)

    p = {}
    p['w1'] = conv_w(ks[0], C0, C1)
    p['b1'] = 0.1 * jax.random.normal(ks[1], (C1,), jnp.float32)
    p['g1'] = 1.0 + 0.1 * jax.random.normal(ks[2], (C1,), jnp.float32)
    p['be1'] = 0.1 * jax.random.normal(ks[3], (C1,), jnp.float32)
    p['w2'] = conv_w(ks[4], C1, C2)
    p['b2'] = 0.1 * jax.random.normal(ks[5], (C2,), jnp.float32)
    p['g2'] = 1.0 + 0.1 * jax.random.normal(ks[6], (C2,), jnp.float32)
    p['be2'] = 0.1 * jax.random.normal(ks[7], (C2,), jnp.float32)
    p['w3'] = conv_w(ks[8], C2, C3)          # fixed: cin is C2 (was C1*4)
    p['b3'] = 0.1 * jax.random.normal(ks[9], (C3,), jnp.float32)
    p['g3'] = 1.0 + 0.1 * jax.random.normal(ks[10], (C3,), jnp.float32)
    p['be3'] = 0.1 * jax.random.normal(ks[11], (C3,), jnp.float32)
    p['wfc'] = (1.0 / C3 ** 0.5) * jax.random.normal(ks[12], (C3, NUM_CLASSES), jnp.float32)
    p['bfc'] = 0.1 * jax.random.normal(ks[13], (NUM_CLASSES,), jnp.float32)
    return p


if __name__ == "__main__":
    key = jax.random.PRNGKey(0)
    pkey, xkey = jax.random.split(key)
    params = init_params(pkey)
    x = jax.random.normal(xkey, (B, 1, L), jnp.float32)   # PyTorch NCL input (B, C=1, L=16)

    out = cnn1d_forward(x, params)
    jax.block_until_ready(out)

    ref = cnn1d_reference(x, params)
    assert out.shape == (B, NUM_CLASSES)
    assert jnp.allclose(out, ref, atol=2e-2, rtol=2e-2), (out, ref)
    print("KERNEL_OK")
</pallas_src>

<mosaic_0001>
module attributes {stable_mosaic.version = 11 : i64} {
  func.func @cnn1d_kernel(%arg0: memref<2x16x16xf32, #tpu.memory_space<vmem>>, %arg1: memref<32x64xf32, #tpu.memory_space<vmem>>, %arg2: memref<128x128xf32, #tpu.memory_space<vmem>>, %arg3: memref<128x8xf32, #tpu.memory_space<vmem>>, %arg4: memref<8x128xf32, #tpu.memory_space<vmem>>, %arg5: memref<2x8xf32, #tpu.memory_space<vmem>>) attributes {dimension_semantics = [], scalar_prefetch = 0 : i64, scratch_operands = 0 : i64, tpu.core_type = #tpu.core_type<tc>} {
    %c0 = arith.constant 0 : index
    %c0_0 = arith.constant 0 : index
    %0 = vector.load %arg4[%c0, %c0_0] : memref<8x128xf32, #tpu.memory_space<vmem>>, vector<8x128xf32>
    %c0_1 = arith.constant 0 : index
    %c0_2 = arith.constant 0 : index
    %c0_3 = arith.constant 0 : index
    %1 = vector.load %arg0[%c0_1, %c0_2, %c0_3] : memref<2x16x16xf32, #tpu.memory_space<vmem>>, vector<2x16x16xf32>
    %2 = vector.extract_strided_slice %0 {offsets = [7, 0], sizes = [1, 16], strides = [1, 1]} : vector<8x128xf32> to vector<1x16xf32>
    %3 = vector.shape_cast %2 : vector<1x16xf32> to vector<16xf32>
    %4 = vector.extract_strided_slice %0 {offsets = [7, 16], sizes = [1, 16], strides = [1, 1]} : vector<8x128xf32> to vector<1x16xf32>
    %5 = vector.shape_cast %4 : vector<1x16xf32> to vector<16xf32>
    %6 = vector.extract_strided_slice %1 {offsets = [0, 0, 0], sizes = [2, 15, 16], strides = [1, 1, 1]} : vector<2x16x16xf32> to vector<2x15x16xf32>
    %7 = vector.shape_cast %3 : vector<16xf32> to vector<1x1x16xf32>
    %8 = vector.broadcast %7 : vector<1x1x16xf32> to vector<2x15x16xf32>
    %9 = arith.mulf %6, %8 : vector<2x15x16xf32>
    %10 = vector.extract_strided_slice %1 {offsets = [0, 1, 0], sizes = [2, 15, 16], strides = [1, 1, 1]} : vector<2x16x16xf32> to vector<2x15x16xf32>
    %11 = vector.shape_cast %5 : vector<16xf32> to vector<1x1x16xf32>
    %12 = vector.broadcast %11 : vector<1x1x16xf32> to vector<2x15x16xf32>
    %13 = arith.mulf %10, %12 : vector<2x15x16xf32>
    %14 = arith.addf %9, %13 : vector<2x15x16xf32>
    %15 = vector.extract_strided_slice %0 {offsets = [0, 0], sizes = [1, 16], strides = [1, 1]} : vector<8x128xf32> to vector<1x16xf32>
    %16 = vector.shape_cast %15 : vector<1x16xf32> to vector<16xf32>
    %17 = vector.extract_strided_slice %0 {offsets = [1, 0], sizes = [1, 16], strides = [1, 1]} : vector<8x128xf32> to vector<1x16xf32>
    %18 = vector.shape_cast %17 : vector<1x16xf32> to vector<16xf32>
    %19 = arith.mulf %14, %14 : vector<2x15x16xf32>
    %cst = arith.constant dense<0.000000e+00> : vector<15x16xf32>
    %20 = vector.multi_reduction <add>, %14, %cst [0] : vector<2x15x16xf32> to vector<15x16xf32>
    %cst_4 = arith.constant dense<0.000000e+00> : vector<15x16xf32>
    %21 = vector.multi_reduction <add>, %19, %cst_4 [0] : vector<2x15x16xf32> to vector<15x16xf32>
    %cst_5 = arith.constant dense<0.000000e+00> : vector<16xf32>
    %22 = vector.multi_reduction <add>, %20, %cst_5 [0] : vector<15x16xf32> to vector<16xf32>
    %cst_6 = arith.constant dense<0.000000e+00> : vector<16xf32>
    %23 = vector.multi_reduction <add>, %21, %cst_6 [0] : vector<15x16xf32> to vector<16xf32>
    %cst_7 = arith.constant 0.0333333351 : f32
    %24 = vector.broadcast %cst_7 : f32 to vector<16xf32>
    %25 = arith.mulf %22, %24 : vector<16xf32>
    %cst_8 = arith.constant 0.0333333351 : f32
    %26 = vector.broadcast %cst_8 : f32 to vector<16xf32>
    %27 = arith.mulf %23, %26 : vector<16xf32>
    %28 = arith.mulf %25, %25 : vector<16xf32>
    %29 = arith.subf %27, %28 : vector<16xf32>
    %cst_9 = arith.constant 9.99999974E-6 : f32
    %30 = vector.broadcast %cst_9 : f32 to vector<16xf32>
    %31 = arith.addf %29, %30 : vector<16xf32>
    %32 = math.rsqrt %31 : vector<16xf32>
    %33 = arith.mulf %16, %32 : vector<16xf32>
    %34 = arith.mulf %25, %33 : vector<16xf32>
    %35 = arith.subf %18, %34 : vector<16xf32>
    %36 = vector.shape_cast %33 : vector<16xf32> to vector<1x1x16xf32>
    %37 = vector.broadcast %36 : vector<1x1x16xf32> to vector<2x15x16xf32>
    %38 = arith.mulf %14, %37 : vector<2x15x16xf32>
    %39 = vector.shape_cast %35 : vector<16xf32> to vector<1x1x16xf32>
    %40 = vector.broadcast %39 : vector<1x1x16xf32> to vector<2x15x16xf32>
    %41 = arith.addf %38, %40 : vector<2x15x16xf32>
    %cst_10 = arith.constant 0.000000e+00 : f32
    %42 = vector.broadcast %cst_10 : f32 to vector<2x15x16xf32>
    %43 = arith.maximumf %41, %42 : vector<2x15x16xf32>
    %44 = vector.extract_strided_slice %43 {offsets = [0, 0, 0], sizes = [2, 14, 16], strides = [1, 1, 1]} : vector<2x15x16xf32> to vector<2x14x16xf32>
    %45 = vector.shape_cast %44 : vector<2x14x16xf32> to vector<2x7x2x16xf32>
    %46 = vector.extract_strided_slice %45 {offsets = [0, 0, 0, 0], sizes = [2, 7, 1, 16], strides = [1, 1, 1, 1]} : vector<2x7x2x16xf32> to vector<2x7x1x16xf32>
    %47 = vector.shape_cast %46 : vector<2x7x1x16xf32> to vector<2x7x16xf32>
    %48 = vector.extract_strided_slice %45 {offsets = [0, 0, 1, 0], sizes = [2, 7, 1, 16], strides = [1, 1, 1, 1]} : vector<2x7x2x16xf32> to vector<2x7x1x16xf32>
    %49 = vector.shape_cast %48 : vector<2x7x1x16xf32> to vector<2x7x16xf32>
    %50 = arith.maximumf %47, %49 : vector<2x7x16xf32>
    %51 = vector.extract_strided_slice %50 {offsets = [0, 0, 0], sizes = [2, 6, 16], strides = [1, 1, 1]} : vector<2x7x16xf32> to vector<2x6x16xf32>
    %52 = vector.extract_strided_slice %50 {offsets = [0, 1, 0], sizes = [2, 6, 16], strides = [1, 1, 1]} : vector<2x7x16xf32> to vector<2x6x16xf32>
    %53 = tpu.concatenate %51, %52 in 2 : vector<2x6x16xf32>, vector<2x6x16xf32> -> vector<2x6x32xf32>
    %54 = vector.shape_cast %53 : vector<2x6x32xf32> to vector<12x32xf32>
    %c0_11 = arith.constant 0 : index
    %c0_12 = arith.constant 0 : index
    %55 = vector.load %arg1[%c0_11, %c0_12] : memref<32x64xf32, #tpu.memory_space<vmem>>, vector<32x64xf32>
    %cst_13 = arith.constant dense<0.000000e+00> : vector<12x64xf32>
    %56 = tpu.matmul %54, %55, %cst_13 {dimension_numbers = #tpu.dot_dimension_numbers<[1], [0], [0], [1], [0, 0, 1, 1], [], []>} : vector<12x32xf32>, vector<32x64xf32>, vector<12x64xf32> -> vector<12x64xf32>
    %57 = vector.extract_strided_slice %0 {offsets = [2, 0], sizes = [1, 64], strides = [1, 1]} : vector<8x128xf32> to vector<1x64xf32>
    %58 = vector.shape_cast %57 : vector<1x64xf32> to vector<64xf32>
    %59 = vector.extract_strided_slice %0 {offsets = [3, 0], sizes = [1, 64], strides = [1, 1]} : vector<8x128xf32> to vector<1x64xf32>
    %60 = vector.shape_cast %59 : vector<1x64xf32> to vector<64xf32>
    %61 = arith.mulf %56, %56 : vector<12x64xf32>
    %cst_14 = arith.constant dense<0.000000e+00> : vector<64xf32>
    %62 = vector.multi_reduction <add>, %56, %cst_14 [0] : vector<12x64xf32> to vector<64xf32>
    %cst_15 = arith.constant dense<0.000000e+00> : vector<64xf32>
    %63 = vector.multi_reduction <add>, %61, %cst_15 [0] : vector<12x64xf32> to vector<64xf32>
    %cst_16 = arith.constant 0.0833333358 : f32
    %64 = vector.broadcast %cst_16 : f32 to vector<64xf32>
    %65 = arith.mulf %62, %64 : vector<64xf32>
    %cst_17 = arith.constant 0.0833333358 : f32
    %66 = vector.broadcast %cst_17 : f32 to vector<64xf32>
    %67 = arith.mulf %63, %66 : vector<64xf32>
    %68 = arith.mulf %65, %65 : vector<64xf32>
    %69 = arith.subf %67, %68 : vector<64xf32>
    %cst_18 = arith.constant 9.99999974E-6 : f32
    %70 = vector.broadcast %cst_18 : f32 to vector<64xf32>
    %71 = arith.addf %69, %70 : vector<64xf32>
    %72 = math.rsqrt %71 : vector<64xf32>
    %73 = arith.mulf %58, %72 : vector<64xf32>
    %74 = arith.mulf %65, %73 : vector<64xf32>
    %75 = arith.subf %60, %74 : vector<64xf32>
    %76 = vector.shape_cast %73 : vector<64xf32> to vector<1x64xf32>
    %77 = vector.broadcast %76 : vector<1x64xf32> to vector<12x64xf32>
    %78 = arith.mulf %56, %77 : vector<12x64xf32>
    %79 = vector.shape_cast %75 : vector<64xf32> to vector<1x64xf32>
    %80 = vector.broadcast %79 : vector<1x64xf32> to vector<12x64xf32>
    %81 = arith.addf %78, %80 : vector<12x64xf32>
    %cst_19 = arith.constant 0.000000e+00 : f32
    %82 = vector.broadcast %cst_19 : f32 to vector<12x64xf32>
    %83 = arith.maximumf %81, %82 : vector<12x64xf32>
    %84 = vector.shape_cast %83 : vector<12x64xf32> to vector<2x3x2x64xf32>
    %85 = vector.extract_strided_slice %84 {offsets = [0, 0, 0, 0], sizes = [2, 3, 1, 64], strides = [1, 1, 1, 1]} : vector<2x3x2x64xf32> to vector<2x3x1x64xf32>
    %86 = vector.shape_cast %85 : vector<2x3x1x64xf32> to vector<2x3x64xf32>
    %87 = vector.extract_strided_slice %84 {offsets = [0, 0, 1, 0], sizes = [2, 3, 1, 64], strides = [1, 1, 1, 1]} : vector<2x3x2x64xf32> to vector<2x3x1x64xf32>
    %88 = vector.shape_cast %87 : vector<2x3x1x64xf32> to vector<2x3x64xf32>
    %89 = arith.maximumf %86, %88 : vector<2x3x64xf32>
    %90 = vector.extract_strided_slice %89 {offsets = [0, 0, 0], sizes = [2, 2, 64], strides = [1, 1, 1]} : vector<2x3x64xf32> to vector<2x2x64xf32>
    %91 = vector.extract_strided_slice %89 {offsets = [0, 1, 0], sizes = [2, 2, 64], strides = [1, 1, 1]} : vector<2x3x64xf32> to vector<2x2x64xf32>
    %92 = tpu.concatenate %90, %91 in 2 : vector<2x2x64xf32>, vector<2x2x64xf32> -> vector<2x2x128xf32>
    %93 = vector.shape_cast %92 : vector<2x2x128xf32> to vector<4x128xf32>
    %c0_20 = arith.constant 0 : index
    %c0_21 = arith.constant 0 : index
    %94 = vector.load %arg2[%c0_20, %c0_21] : memref<128x128xf32, #tpu.memory_space<vmem>>, vector<128x128xf32>
    %cst_22 = arith.constant dense<0.000000e+00> : vector<4x128xf32>
    %95 = tpu.matmul %93, %94, %cst_22 {dimension_numbers = #tpu.dot_dimension_numbers<[1], [0], [0], [1], [0, 0, 1, 1], [], []>} : vector<4x128xf32>, vector<128x128xf32>, vector<4x128xf32> -> vector<4x128xf32>
    %96 = vector.extract_strided_slice %0 {offsets = [4, 0], sizes = [1, 128], strides = [1, 1]} : vector<8x128xf32> to vector<1x128xf32>
    %97 = vector.shape_cast %96 : vector<1x128xf32> to vector<128xf32>
    %98 = vector.extract_strided_slice %0 {offsets = [5, 0], sizes = [1, 128], strides = [1, 1]} : vector<8x128xf32> to vector<1x128xf32>
    %99 = vector.shape_cast %98 : vector<1x128xf32> to vector<128xf32>
    %100 = arith.mulf %95, %95 : vector<4x128xf32>
    %cst_23 = arith.constant dense<0.000000e+00> : vector<128xf32>
    %101 = vector.multi_reduction <add>, %95, %cst_23 [0] : vector<4x128xf32> to vector<128xf32>
    %cst_24 = arith.constant dense<0.000000e+00> : vector<128xf32>
    %102 = vector.multi_reduction <add>, %100, %cst_24 [0] : vector<4x128xf32> to vector<128xf32>
    %cst_25 = arith.constant 2.500000e-01 : f32
    %103 = vector.broadcast %cst_25 : f32 to vector<128xf32>
    %104 = arith.mulf %101, %103 : vector<128xf32>
    %cst_26 = arith.constant 2.500000e-01 : f32
    %105 = vector.broadcast %cst_26 : f32 to vector<128xf32>
    %106 = arith.mulf %102, %105 : vector<128xf32>
    %107 = arith.mulf %104, %104 : vector<128xf32>
    %108 = arith.subf %106, %107 : vector<128xf32>
    %cst_27 = arith.constant 9.99999974E-6 : f32
    %109 = vector.broadcast %cst_27 : f32 to vector<128xf32>
    %110 = arith.addf %108, %109 : vector<128xf32>
    %111 = math.rsqrt %110 : vector<128xf32>
    %112 = arith.mulf %97, %111 : vector<128xf32>
    %113 = arith.mulf %104, %112 : vector<128xf32>
    %114 = arith.subf %99, %113 : vector<128xf32>
    %115 = vector.shape_cast %112 : vector<128xf32> to vector<1x128xf32>
    %116 = vector.broadcast %115 : vector<1x128xf32> to vector<4x128xf32>
    %117 = arith.mulf %95, %116 : vector<4x128xf32>
    %118 = vector.shape_cast %114 : vector<128xf32> to vector<1x128xf32>
    %119 = vector.broadcast %118 : vector<1x128xf32> to vector<4x128xf32>
    %120 = arith.addf %117, %119 : vector<4x128xf32>
    %cst_28 = arith.constant 0.000000e+00 : f32
    %121 = vector.broadcast %cst_28 : f32 to vector<4x128xf32>
    %122 = arith.maximumf %120, %121 : vector<4x128xf32>
    %123 = vector.shape_cast %122 : vector<4x128xf32> to vector<2x2x128xf32>
    %124 = vector.extract_strided_slice %123 {offsets = [0, 0, 0], sizes = [2, 1, 128], strides = [1, 1, 1]} : vector<2x2x128xf32> to vector<2x1x128xf32>
    %125 = vector.shape_cast %124 : vector<2x1x128xf32> to vector<2x128xf32>
    %126 = vector.extract_strided_slice %123 {offsets = [0, 1, 0], sizes = [2, 1, 128], strides = [1, 1, 1]} : vector<2x2x128xf32> to vector<2x1x128xf32>
    %127 = vector.shape_cast %126 : vector<2x1x128xf32> to vector<2x128xf32>
    %128 = arith.maximumf %125, %127 : vector<2x128xf32>
    %c0_29 = arith.constant 0 : index
    %c0_30 = arith.constant 0 : index
    %129 = vector.load %arg3[%c0_29, %c0_30] : memref<128x8xf32, #tpu.memory_space<vmem>>, vector<128x8xf32>
    %cst_31 = arith.constant dense<0.000000e+00> : vector<2x8xf32>
    %130 = tpu.matmul %128, %129, %cst_31 {dimension_numbers = #tpu.dot_dimension_numbers<[1], [0], [0], [1], [0, 0, 1, 1], [], []>} : vector<2x128xf32>, vector<128x8xf32>, vector<2x8xf32> -> vector<2x8xf32>
    %131 = vector.extract_strided_slice %0 {offsets = [6, 0], sizes = [1, 8], strides = [1, 1]} : vector<8x128xf32> to vector<1x8xf32>
    %132 = vector.shape_cast %131 : vector<1x8xf32> to vector<8xf32>
    %133 = vector.shape_cast %132 : vector<8xf32> to vector<1x8xf32>
    %134 = vector.broadcast %133 : vector<1x8xf32> to vector<2x8xf32>
    %135 = arith.addf %130, %134 : vector<2x8xf32>
    %c0_32 = arith.constant 0 : index
    %c0_33 = arith.constant 0 : index
    %136 = vector.load %arg5[%c0_32, %c0_33] : memref<2x8xf32, #tpu.memory_space<vmem>>, vector<2x8xf32>
    tpu.vector_store %arg5[%c0_32, %c0_33], %135 {strides = array<i32>} : memref<2x8xf32, #tpu.memory_space<vmem>>, vector<2x8xf32>,
    return
  }
}

</mosaic_0001>

<bundles_post_ra>
// kernel: tpu_custom_call.1
= control target key start
LH: loop header
LB: loop body
LE: loop exit
PB: predicated region body
PF: predicated region fallthrough
CT: control target
= control target key end

     0   :  { %10 = vsyncpa [#allocation3], 0  ;;  %s1497_s0 = inlined_call_operand.hbm [shape: f32[2,16,16], index: 0, kind: input, shape index: {}]   ;;  %s1498_s1 = inlined_call_operand.hbm [shape: f32[32,64], index: 1, kind: input, shape index: {}]   ;;  %s1499_s2 = inlined_call_operand.vmem [shape: f32[128,128], index: 2, kind: input, shape index: {}]   ;;  %s1500_s3 = inlined_call_operand.vmem [shape: f32[128,8], index: 3, kind: input, shape index: {}]   ;;  %s1501_s4 = inlined_call_operand.vmem [shape: f32[8,128], index: 4, kind: input, shape index: {}]   ;;  %s1502_s5 = inlined_call_operand.hbm [shape: f32[2,8], index: 5, kind: output, shape index: {}]  }
   0x1   :  { %11 = vsyncpa [#allocation6], 0 }
   0x2   :  { %12 = vsyncpa [#allocation4], 0  ;;  %s1197_s18 = smov [#allocation2]  }
   0x3   :  { %s18_s19 = sshll.u32 %s1197_s18, 4  ;;  %s19_s19 = int_to_ptr.vmem [resolvable:$true] %s18_s19 }
   0x4   :  { %s1139_s20 = scalar_lea.vmem %s19_s19, 512  ;;  %p1144_p1 = scmp.lt.s32.totalorder %s19_s19, %s19_s19 }
   0x5   :  { %p1140_p0 = scmp.ne.s32.totalorder %s19_s19, %s1139_s20  ;;  %p1145_p2 = scmp.lt.s32.totalorder %s1139_s20, %s1139_s20 }
   0x7   :  { %p1146_p3 = por %p1145_p2, %p1144_p1 }
   0x9   :  { %p1147_p4 = pnand %p1146_p3, %p1140_p0 }
   0xb   :  { %1150 = shalt.err (!%p1147_p4)
}
   0xc   :  { %s1198_s21 = smov 128   ;;  %s1199_s22 = smov 8  }
   0xd   :  { %24 = dma.hbm_to_vmem [thread:$0]  %s1497_s0, 512, %s19_s19, [#allocation3], %s1198_s21, %s1198_s21, %s1199_s22  }
   0xe   :  { %s1200_s25 = smov [#allocation5]  }
   0xf   :  { %s30_s26 = sshll.u32 %s1200_s25, 4  ;;  %s31_s26 = int_to_ptr.vmem [resolvable:$true] %s30_s26 }
  0x10   :  { %s1159_s27 = scalar_lea.vmem %s31_s26, 512  ;;  %p1164_p6 = scmp.lt.s32.totalorder %s31_s26, %s31_s26 }
  0x11   :  { %p1160_p5 = scmp.ne.s32.totalorder %s31_s26, %s1159_s27  ;;  %p1165_p7 = scmp.lt.s32.totalorder %s1159_s27, %s1159_s27 }
  0x13   :  { %p1166_p8 = por %p1165_p7, %p1164_p6 }
  0x15   :  { %p1167_p9 = pnand %p1166_p8, %p1160_p5 }
  0x17   :  { %1170 = shalt.err (!%p1167_p9)
}
  0x18   :  { %36 = dma.hbm_to_vmem [thread:$0]  %s1498_s1, 512, %s31_s26, [#allocation6], %s1198_s21, %s1198_s21, %s1199_s22  }
  0x19   :  { %1191 = dma.done.wait [#allocation3], 512  }
  0x1a   :  { %1192 = vsyncadd [#allocation3], 4294966784 }
  0x1b   :  { %1193 = dma.done.wait [#allocation6], 512  }
  0x1c   :  { %1194 = vsyncadd [#allocation6], 4294966784  ;;  %v54_v0 = vlaneseq  ;;  %v1250_v3 = vld [vmem:[%s1501_s4] sm:$0xff]  ;;  %s1201_s6 = smov 112   ;;  %v51_v6 = vld [vmem:[#allocation2 + $0x8] sm:$0xff]  ;;  %vm74_vm0 = vcmask 1046528  }
  0x1d   :  { %v50_v5 = vld [vmem:[#allocation2] sm:$0xff]  ;;  %v52_v7 = vld [vmem:[#allocation2 + $0x10] sm:$0xff]  ;;  %v53_v8 = vld [vmem:[#allocation2 + $0x18] sm:$0xff]  ;;  %vm93_vm1 = vcmask 130048   ;;  %vm97_vm2 = vcmask 129024   ;;  %vm357_vm3 = vcmask 1041409  }
  0x1e   :  { %v1244_v1 = vshrl.u32 %v54_v0, 7  ;;  %vm359_vm4 = vcmask 1042434   ;;  %vm361_vm5 = vcmask 1043459   ;;  %vm363_vm6 = vcmask 1044484   ;;  %s1203_s1 = smov 16  }
  0x1f   :  { %vm365_vm7 = vcmask 1045509   ;;  %vm465_vm8 = vcmask 261120   ;;  %vm549_vm9 = vcmask 519168   ;;  %vm547_vm10 = vcmask 523264  }
  0x20   :  { %v56_v2 = vsub.s32 7, %v1244_v1  ;;  %vm1205_vm11 = vmmov 0   ;;  %vm792_vm12 = vcmask 1043456   ;;  %vm951_vm13 = vcmask 58368  }
  0x22   :  { %v57_v4 = vrot.slane %v1250_v3, %v56_v2 }
  0x24   :  { %63 = vrot.lane.b32.xlu0 %v57_v4, %s1201_s6  ;;  %v59_v10 = vmul.f32 %v57_v4, %v51_v6  ;;  %v61_v11 = vmul.f32 %v57_v4, %v53_v8  ;;  %v58_v16 = vmul.f32 %v57_v4, %v50_v5  ;;  %v60_v17 = vmul.f32 %v57_v4, %v52_v7 }
  0x96   :  { %v64_v9 = vpop.permute.xlu0 %63 }
  0x97   :  { %v66_v12 = vmul.f32 %v64_v9, %v50_v5  ;;  %v67_v13 = vmul.f32 %v64_v9, %v51_v6  ;;  %v68_v14 = vmul.f32 %v64_v9, %v52_v7  ;;  %v69_v15 = vmul.f32 %v64_v9, %v53_v8 }
  0x98   :  { %v1266_v6 = vsub.s32 0, %v1244_v1  ;;  %v1202_v8 = vmov 1983009808  }
  0x99   :  { %v75_v18 = vrot.slane %v66_v12, 1  ;;  %v76_v19 = vrot.slane %v67_v13, 1  ;;  %v78_v20 = vrot.slane %v68_v14, 1  ;;  %v79_v21 = vrot.slane %v69_v15, 1 }
  0x9a   :  { %v163_v9 = vunpack.c.l.s4 %v1202_v8  ;;  %v147_v12 = vsub.s32 1, %v1244_v1 }
  0x9b   :  { %v77_v22 = vsel %vm74_vm0, %v75_v18, %v76_v19  ;;  %v80_v23 = vsel %vm74_vm0, %v78_v20, %v79_v21  ;;  %v86_v24 = vadd.f32 %v76_v19, %v59_v10  ;;  %v88_v25 = vadd.f32 %v79_v21, %v61_v11 }
  0x9c   :  { %v85_v26 = vadd.f32 %v77_v22, %v58_v16  ;;  %v87_v27 = vadd.f32 %v80_v23, %v60_v17  ;;  %v164_v14 = vunpack.c.0.s8 %v163_v9 }
  0x9d   :  { %v90_v28 = vmul.f32 %v86_v24, %v86_v24  ;;  %v92_v29 = vmul.f32 %v88_v25, %v88_v25  ;;  %v98_v30 = vsel %vm97_vm2, %v86_v24, 0.0  ;;  %v99_v31 = vsel %vm97_vm2, %v88_v25, 0.0 }
  0x9e   :  { %v89_v32 = vmul.f32 %v85_v26, %v85_v26  ;;  %v91_v33 = vmul.f32 %v87_v27, %v87_v27  ;;  %v94_v34 = vsel %vm93_vm1, %v85_v26, 0.0  ;;  %v95_v35 = vsel %vm93_vm1, %v87_v27, 0.0 }
  0x9f   :  { %v96_v36 = vadd.f32 %v95_v35, %v94_v34  ;;  %v100_v37 = vadd.f32 %v99_v31, %v98_v30  ;;  %v104_v38 = vsel %vm97_vm2, %v90_v28, 0.0  ;;  %v105_v39 = vsel %vm97_vm2, %v92_v29, 0.0 }
  0xa0   :  { %v101_v40 = vsel %vm93_vm1, %v89_v32, 0.0  ;;  %v102_v41 = vsel %vm93_vm1, %v91_v33, 0.0  ;;  %v106_v42 = vadd.f32 %v105_v39, %v104_v38  ;;  %v1273_v21 = vsub.s32 %v164_v14, %v1244_v1 }
  0xa1   :  { %v103_v43 = vadd.f32 %v102_v41, %v101_v40  ;;  %v107_v44 = vsel %vm93_vm1, %v96_v36, 0.0  ;;  %v108_v45 = vsel %vm97_vm2, %v100_v37, 0.0 }
  0xa2   :  { %v109_v46 = vadd.f32 %v108_v45, %v107_v44  ;;  %v117_v47 = vsel %vm97_vm2, %v106_v42, 0.0 }
  0xa3   :  { %v116_v48 = vsel %vm93_vm1, %v103_v43, 0.0 }
  0xa4   :  { %v110_v49 = vrot.slane %v109_v46, 4  ;;  %v118_v50 = vadd.f32 %v117_v47, %v116_v48 }
  0xa6   :  { %v111_v51 = vadd.f32 %v110_v49, %v109_v46  ;;  %v119_v52 = vrot.slane %v118_v50, 4 }
  0xa8   :  { %v112_v53 = vrot.slane %v111_v51, 2  ;;  %v120_v54 = vadd.f32 %v119_v52, %v118_v50 }
  0xaa   :  { %v113_v55 = vadd.f32 %v112_v53, %v111_v51  ;;  %v121_v56 = vrot.slane %v120_v54, 2 }
  0xac   :  { %v114_v57 = vrot.slane %v113_v55, 1  ;;  %v122_v58 = vadd.f32 %v121_v56, %v120_v54 }
  0xae   :  { %v115_v59 = vadd.f32 %v114_v57, %v113_v55  ;;  %v123_v60 = vrot.slane %v122_v58, 1 }
  0xb0   :  { %v124_v61 = vadd.f32 %v123_v60, %v122_v58  ;;  %v125_v62 = vmul.f32 0.033333335, %v115_v59 }
  0xb2   :  { %v126_v63 = vmul.f32 0.033333335, %v124_v61  ;;  %v127_v0 = vmul.f32 %v125_v62, %v125_v62 }
  0xb4   :  { %v128_v2 = vsub.f32 %v126_v63, %v127_v0 }
  0xb6   :  { %v129_v4 = vadd.f32 1e-05, %v128_v2 }
  0xb8   :  { %1125 = vrsqrt.f32 %v129_v4 }
  0xc5   :  { %v1126_v5 = vpop.eup %1125 }
  0xc6   :  { %v131_v7 = vmul.f32 %v1126_v5, %v1250_v3 }
  0xc8   :  { %v132_v10 = vmul.f32 %v131_v7, %v125_v62  ;;  %v140_v11 = vrot.slane %v131_v7, %v1266_v6 }
  0xca   :  { %v134_v13 = vrot.slane %v132_v10, 7  ;;  %v141_v16 = vmul.f32 %v140_v11, %v85_v26  ;;  %v142_v17 = vmul.f32 %v140_v11, %v86_v24  ;;  %v143_v18 = vmul.f32 %v140_v11, %v87_v27 }
  0xcb   :  { %v144_v19 = vmul.f32 %v140_v11, %v88_v25 }
  0xcc   :  { %v136_v15 = vsub.f32 %v1250_v3, %v134_v13 }
  0xce   :  { %v148_v20 = vrot.slane %v136_v15, %v147_v12 }
  0xd0   :  { %v149_v22 = vadd.f32 %v148_v20, %v141_v16  ;;  %v151_v23 = vadd.f32 %v148_v20, %v143_v18  ;;  %v152_v28 = vadd.f32 %v148_v20, %v144_v19  ;;  %v150_v29 = vadd.f32 %v148_v20, %v142_v17  ;;  %v439_v20 = vld [vmem:[#allocation5 + $0x18] sm:$0xff] }
  0xd1   :  { %1033 = vmatprep.subr.mxu0 %v439_v20 }
  0xd2   :  { %v153_v30 = vmax.f32 %v149_v22, 0.0  ;;  %v155_v31 = vmax.f32 %v151_v23, 0.0  ;;  %v156_v32 = vmax.f32 %v152_v28, 0.0  ;;  %v154_v33 = vmax.f32 %v150_v29, 0.0  ;;  %v438_v22 = vld [vmem:[#allocation5 + $0x10] sm:$0xff]  ;;  %1034 = vmatpush3.msra.mxu0 %v439_v20  ;;  %v702_v20 = vld [vmem:[%s1499_s2 + $0x40] sm:$0xff] }
  0xd3   :  { %1035 = vmatprep.subr.mxu0 %v438_v22 }
  0xd4   :  { %v161_v34 = vcombine.high %v153_v30, %v153_v30  ;;  %v1276_v35 = vrot.slane %v153_v30, %v1273_v21  ;;  %v194_v24 = vcombine.high %v155_v31, %v155_v31  ;;  %v201_v25 = vrot.slane %v155_v31, %v1273_v21  ;;  %1036 = vmatpush3.msra.mxu0 %v438_v22  ;;  %v701_v22 = vld [vmem:[%s1499_s2 + $0x38] sm:$0xff] }
  0xd5   :  { %v211_v26 = vcombine.high %v156_v32, %v156_v32  ;;  %v218_v27 = vrot.slane %v156_v32, %v1273_v21  ;;  %v178_v36 = vcombine.high %v154_v33, %v154_v33  ;;  %v185_v37 = vrot.slane %v154_v33, %v1273_v21  ;;  %v437_v33 = vld [vmem:[#allocation5 + $0x8] sm:$0xff] }
  0xd6   :  { %v175_v38 = vrot.slane %v161_v34, %v1273_v21  ;;  %v208_v39 = vrot.slane %v194_v24, %v1273_v21  ;;  %v209_v40 = vcombine.high %v201_v25, %v201_v25  ;;  %v176_v41 = vcombine.high %v1276_v35, %v1276_v35  ;;  %1037 = vmatprep.subr.mxu0 %v437_v33 }
  0xd7   :  { %v225_v42 = vrot.slane %v211_v26, %v1273_v21  ;;  %v226_v43 = vcombine.high %v218_v27, %v218_v27  ;;  %v980_v44 = vrot.slane %v218_v27, 9  ;;  %v192_v45 = vrot.slane %v178_v36, %v1273_v21  ;;  %1038 = vmatpush3.msra.mxu0 %v437_v33 }
  0xd8   :  { %v210_v46 = vcombine.high %v208_v39, %v208_v39  ;;  %v977_v47 = vrot.slane %v209_v40, 9  ;;  %v978_v48 = vrot.slane %v208_v39, 9  ;;  %v177_v49 = vcombine.high %v175_v38, %v175_v38 }
  0xd9   :  { %v981_v50 = vrot.slane %v226_v43, 9  ;;  %v982_v51 = vrot.slane %v225_v42, 9  ;;  %v294_v52 = vmax.f32 %v218_v27, %v980_v44  ;;  %v193_v53 = vcombine.high %v185_v37, %v185_v37 }
  0xda   :  { %v979_v54 = vrot.slane %v210_v46, 9  ;;  %v291_v55 = vmax.f32 %v209_v40, %v977_v47  ;;  %v292_v56 = vmax.f32 %v208_v39, %v978_v48  ;;  %v970_v57 = vrot.slane %v176_v41, 9 }
  0xdb   :  { %v295_v58 = vmax.f32 %v226_v43, %v981_v50  ;;  %v296_v59 = vmax.f32 %v225_v42, %v982_v51  ;;  %v971_v60 = vrot.slane %v175_v38, 9  ;;  %v972_v0 = vrot.slane %v177_v49, 9 }
  0xdc   :  { %v293_v61 = vmax.f32 %v210_v46, %v979_v54  ;;  %v340_v62 = vrot.slane %v291_v55, %v1266_v6  ;;  %v344_v63 = vrot.slane %v292_v56, %v1266_v6  ;;  %v352_v2 = vrot.slane %v294_v52, %v1266_v6 }
  0xdd   :  { %v356_v4 = vrot.slane %v295_v58, %v1266_v6  ;;  %v973_v5 = vrot.slane %v185_v37, 9  ;;  %v974_v7 = vrot.slane %v193_v53, 9  ;;  %v975_v10 = vrot.slane %v192_v45, 9 }
  0xde   :  { %v348_v8 = vrot.slane %v293_v61, %v1266_v6  ;;  %v389_v9 = vsel %vm357_vm3, %v344_v63, %v340_v62  ;;  %v284_v11 = vmax.f32 %v176_v41, %v970_v57  ;;  %v383_v12 = vrot.slane %v296_v59, %v1266_v6 }
  0xdf   :  { %v285_v13 = vmax.f32 %v175_v38, %v971_v60  ;;  %v286_v14 = vmax.f32 %v177_v49, %v972_v0  ;;  %v287_v15 = vmax.f32 %v185_v37, %v973_v5  ;;  %v288_v17 = vmax.f32 %v193_v53, %v974_v7 }
  0xe0   :  { %v390_v16 = vsel %vm359_vm4, %v348_v8, %v389_v9  ;;  %v316_v18 = vrot.slane %v284_v11, %v1266_v6  ;;  %v976_v19 = vrot.slane %v201_v25, 9  ;;  %v289_v28 = vmax.f32 %v192_v45, %v975_v10 }
  0xe1   :  { %v391_v23 = vsel %vm361_vm5, %v352_v2, %v390_v16  ;;  %v320_v29 = vrot.slane %v285_v13, %v1266_v6  ;;  %v324_v30 = vrot.slane %v286_v14, %v1266_v6  ;;  %v328_v24 = vrot.slane %v287_v15, %v1266_v6  ;;  %v708_v14 = vld [vmem:[%s1499_s2 + $0x70] sm:$0xff]  ;;  %v707_v15 = vld [vmem:[%s1499_s2 + $0x68] sm:$0xff]  ;;  %v706_v16 = vld [vmem:[%s1499_s2 + $0x60] sm:$0xff] }
  0xe2   :  { %v392_v31 = vsel %vm363_vm6, %v356_v4, %v391_v23  ;;  %v290_v32 = vmax.f32 %v201_v25, %v976_v19  ;;  %v969_v27 = vrot.slane %v1276_v35, 9  ;;  %v332_v36 = vrot.slane %v288_v17, %v1266_v6  ;;  %v436_v25 = vld [vmem:[#allocation5] sm:$0xff]  ;;  %v705_v17 = vld [vmem:[%s1499_s2 + $0x58] sm:$0xff]  ;;  %v703_v19 = vld [vmem:[%s1499_s2 + $0x48] sm:$0xff] }
  0xe3   :  { %v393_v34 = vsel %vm365_vm7, %v383_v12, %v392_v31  ;;  %v384_v26 = vsel %vm357_vm3, %v320_v29, %v316_v18  ;;  %v379_v39 = vrot.slane %v289_v28, %v1266_v6  ;;  %1039 = vmatprep.subr.mxu0 %v436_v25  ;;  %v709_v12 = vld [vmem:[%s1499_s2 + $0x78] sm:$0xff]  ;;  %v1204_v13 = vmov 0.0   ;;  %v700_v23 = vld [vmem:[%s1499_s2 + $0x30] sm:$0xff]  ;;  %v699_v28 = vld [vmem:[%s1499_s2 + $0x28] sm:$0xff] }
  0xe4   :  { %396 = vrot.lane.b32.xlu1 %v393_v34, %s1203_s1  ;;  %v385_v37 = vsel %vm359_vm4, %v324_v30, %v384_v26  ;;  %v336_v38 = vrot.slane %v290_v32, %v1266_v6  ;;  %v283_v41 = vmax.f32 %v1276_v35, %v969_v27  ;;  %1040 = vmatpush3.msra.mxu0 %v436_v25 }
  0xe5   :  { %v386_v40 = vsel %vm361_vm5, %v328_v24, %v385_v37  ;;  %1044 = vmatprep.subr.mxu1 %v1204_v13  ;;  %1079 = vmatprep.subr.mxu0 %v1204_v13 }
  0xe6   :  { %v387_v42 = vsel %vm363_vm6, %v332_v36, %v386_v40  ;;  %v367_v43 = vsel %vm357_vm3, %v340_v62, %v336_v38  ;;  %v312_v46 = vrot.slane %v283_v41, %v1266_v6  ;;  %1045 = vmatpush3.msra.mxu1 %v709_v12  ;;  %1076 = vmatprep.mubr.msk.f32.mxu1 %vm1205_vm11, %v1204_v13 }
  0xe7   :  { %v388_v44 = vsel %vm365_vm7, %v379_v39, %v387_v42  ;;  %v368_v45 = vsel %vm359_vm4, %v344_v63, %v367_v43  ;;  %1046 = vmatprep.subr.mxu1 %v1204_v13 }
  0xe8   :  { %394 = vrot.lane.b32.xlu0 %v388_v44, %s1203_s1  ;;  %v369_v47 = vsel %vm361_vm5, %v348_v8, %v368_v45  ;;  %v358_v35 = vsel %vm357_vm3, %v316_v18, %v312_v46  ;;  %1047 = vmatpush3.msra.mxu1 %v708_v14  ;;  %v704_v18 = vld [vmem:[%s1499_s2 + $0x50] sm:$0xff]  ;;  %v694_v14 = vld [vmem:[%s1499_s2] sm:$0xff] }
  0xe9   :  { %v370_v48 = vsel %vm363_vm6, %v352_v2, %v369_v47  ;;  %v360_v50 = vsel %vm359_vm4, %v320_v29, %v358_v35  ;;  %1048 = vmatprep.subr.mxu1 %v1204_v13  ;;  %v698_v29 = vld [vmem:[%s1499_s2 + $0x20] sm:$0xff] }
  0xea   :  { %v371_v49 = vsel %vm365_vm7, %v356_v4, %v370_v48  ;;  %v362_v51 = vsel %vm361_vm5, %v324_v30, %v360_v50  ;;  %1049 = vmatpush3.msra.mxu1 %v707_v15  ;;  %v697_v30 = vld [vmem:[%s1499_s2 + $0x18] sm:$0xff] }
  0xeb   :  { %v364_v52 = vsel %vm363_vm6, %v328_v24, %v362_v51  ;;  %1050 = vmatprep.subr.mxu1 %v1204_v13 }
  0xec   :  { %v366_v53 = vsel %vm365_vm7, %v332_v36, %v364_v52  ;;  %1051 = vmatpush3.msra.mxu1 %v706_v16 }
  0xed   :  { %1052 = vmatprep.subr.mxu1 %v1204_v13 }
  0xee   :  { %1053 = vmatpush3.msra.mxu1 %v705_v17 }
  0xef   :  { %1054 = vmatprep.subr.mxu1 %v1204_v13 }
  0xf0   :  { %1055 = vmatpush3.msra.mxu1 %v704_v18 }
  0xf1   :  { %1056 = vmatprep.subr.mxu1 %v1204_v13 }
  0xf2   :  { %1057 = vmatpush3.msra.mxu1 %v703_v19 }
  0xf3   :  { %1058 = vmatprep.subr.mxu1 %v1204_v13 }
  0xf4   :  { %1059 = vmatpush3.msra.mxu1 %v702_v20 }
  0xf5   :  { %1060 = vmatprep.subr.mxu1 %v1204_v13 }
  0xf6   :  { %1061 = vmatpush3.msra.mxu1 %v701_v22 }
  0xf7   :  { %1062 = vmatprep.subr.mxu1 %v1204_v13 }
  0xf8   :  { %1063 = vmatpush3.msra.mxu1 %v700_v23 }
  0xf9   :  { %1064 = vmatprep.subr.mxu1 %v1204_v13 }
  0xfa   :  { %1065 = vmatpush3.msra.mxu1 %v699_v28 }
  0xfb   :  { %1066 = vmatprep.subr.mxu1 %v1204_v13 }
  0xfc   :  { %1067 = vmatpush3.msra.mxu1 %v698_v29 }
  0xfd   :  { %1068 = vmatprep.subr.mxu1 %v1204_v13 }
  0xfe   :  { %1069 = vmatpush3.msra.mxu1 %v697_v30 }
  0xff   :  { %1070 = vmatprep.subr.mxu1 %v1204_v13 }
 0x156   :  { %v397_v54 = vpop.permute.xlu1 %396 }
 0x157   :  { %v401_v55 = vsel %vm93_vm1, %v371_v49, %v397_v54 }
 0x158   :  { %v420_v56 = vcombine.high %v401_v55, %v401_v55  ;;  %v427_v57 = vrot.slane %v401_v55, %v1273_v21 }
 0x15a   :  { %v395_v58 = vpop.permute.xlu0 %394  ;;  %v434_v62 = vrot.slane %v420_v56, %v1273_v21  ;;  %v435_v63 = vcombine.high %v427_v57, %v427_v57  ;;  %v581_v56 = vsub.s32 2, %v1244_v1 }
 0x15b   :  { %v400_v59 = vsel %vm93_vm1, %v366_v53, %v395_v58 }
 0x15c   :  { %v404_v60 = vcombine.high %v400_v59, %v400_v59  ;;  %v411_v61 = vrot.slane %v400_v59, %v1273_v21  ;;  %v457_v7 = vcombine.low %v435_v63, %v434_v62 }
 0x15e   :  { %v418_v0 = vrot.slane %v404_v60, %v1273_v21  ;;  %v419_v2 = vcombine.high %v411_v61, %v411_v61  ;;  %v464_v11 = vrot.slane %v457_v7, %v1273_v21  ;;  %v587_v60 = vsub.s32 3, %v1244_v1 }
 0x160   :  { %v440_v4 = vcombine.low %v411_v61, %v419_v2  ;;  %v441_v5 = vcombine.low %v418_v0, %v427_v57 }
 0x162   :  { %v448_v8 = vrot.slane %v440_v4, %v1273_v21  ;;  %v455_v9 = vrot.slane %v441_v5, %v1273_v21 }
 0x164   :  { %v456_v10 = vcombine.low %v448_v8, %v455_v9  ;;  %v696_v8 = vld [vmem:[%s1499_s2 + $0x10] sm:$0xff]  ;;  %v695_v9 = vld [vmem:[%s1499_s2 + $0x8] sm:$0xff]  ;;  %s1206_s2 = smov 64  }
 0x165   :  { %1071 = vmatpush3.msra.mxu1 %v696_v8 }
 0x166   :  { %1041 = vmatprep.mubr.msk.f32.mxu0 %vm465_vm8, %v456_v10  ;;  %1072 = vmatprep.subr.mxu1 %v1204_v13 }
 0x167   :  { %1042 = vmatmul.mubr.msk.f32.vlgmr.msra.gmra.mxu0 %vm465_vm8, %v464_v11  ;;  %1073 = vmatpush3.msra.mxu1 %v695_v9 }
 0x168   :  { %1111 = vmatprep.mubr.msk.f32.mxu0 %vm1205_vm11, %v1204_v13  ;;  %1074 = vmatprep.subr.mxu1 %v1204_v13 }
 0x169   :  { %1075 = vmatpush3.msra.mxu1 %v694_v14 }
 0x227   :  { %v1043_v31 = vpop.f32.mrf.mxu0 }
 0x228   :  { %v546_v32 = vmul.f32 %v1043_v31, %v1043_v31  ;;  %v550_v34 = vsel %vm549_vm9, %v1043_v31, 0.0 }
 0x229   :  { %v536_v33 = vpop.f32.mrf.mxu0 }
 0x22a   :  { %v545_v24 = vmul.f32 %v536_v33, %v536_v33  ;;  %v548_v26 = vsel %vm547_vm10, %v536_v33, 0.0  ;;  %v559_v36 = vsel %vm549_vm9, %v546_v32, 0.0 }
 0x22b   :  { %v551_v27 = vadd.f32 %v550_v34, %v548_v26 }
 0x22c   :  { %v558_v37 = vsel %vm547_vm10, %v545_v24, 0.0 }
 0x22d   :  { %v552_v38 = vrot.slane %v551_v27, 4  ;;  %v560_v25 = vadd.f32 %v559_v36, %v558_v37 }
 0x22f   :  { %v553_v39 = vadd.f32 %v552_v38, %v551_v27  ;;  %v561_v40 = vrot.slane %v560_v25, 4 }
 0x231   :  { %v554_v41 = vrot.slane %v553_v39, 2  ;;  %v562_v42 = vadd.f32 %v561_v40, %v560_v25 }
 0x233   :  { %v555_v43 = vadd.f32 %v554_v41, %v553_v39  ;;  %v563_v44 = vrot.slane %v562_v42, 2 }
 0x235   :  { %v556_v45 = vrot.slane %v555_v43, 1  ;;  %v564_v46 = vadd.f32 %v563_v44, %v562_v42 }
 0x237   :  { %v557_v47 = vadd.f32 %v556_v45, %v555_v43  ;;  %v565_v48 = vrot.slane %v564_v46, 1 }
 0x239   :  { %v566_v35 = vadd.f32 %v565_v48, %v564_v46  ;;  %v567_v49 = vmul.f32 0.083333336, %v557_v47 }
 0x23b   :  { %v568_v50 = vmul.f32 0.083333336, %v566_v35  ;;  %v569_v51 = vmul.f32 %v567_v49, %v567_v49  ;;  %v864_v35 = vld [vmem:[%s1500_s3 + $0x78] sm:$0xff] }
 0x23c   :  { %1080 = vmatpush3.msra.mxu0 %v864_v35 }
 0x23d   :  { %v570_v52 = vsub.f32 %v568_v50, %v569_v51  ;;  %1081 = vmatprep.subr.mxu0 %v1204_v13  ;;  %v862_v50 = vld [vmem:[%s1500_s3 + $0x68] sm:$0xff]  ;;  %v861_v51 = vld [vmem:[%s1500_s3 + $0x60] sm:$0xff] }
 0x23f   :  { %v571_v53 = vadd.f32 1e-05, %v570_v52  ;;  %v860_v52 = vld [vmem:[%s1500_s3 + $0x58] sm:$0xff] }
 0x241   :  { %1127 = vrsqrt.f32 %v571_v53  ;;  %v859_v53 = vld [vmem:[%s1500_s3 + $0x50] sm:$0xff] }
 0x24e   :  { %v1128_v54 = vpop.eup %1127 }
 0x24f   :  { %v573_v55 = vmul.f32 %v1128_v54, %v1250_v3  ;;  %v858_v54 = vld [vmem:[%s1500_s3 + $0x48] sm:$0xff] }
 0x251   :  { %v574_v57 = vmul.f32 %v573_v55, %v567_v49  ;;  %v582_v59 = vrot.slane %v573_v55, %v581_v56  ;;  %v863_v49 = vld [vmem:[%s1500_s3 + $0x70] sm:$0xff]  ;;  %v857_v55 = vld [vmem:[%s1500_s3 + $0x40] sm:$0xff]  ;;  %v856_v56 = vld [vmem:[%s1500_s3 + $0x38] sm:$0xff] }
 0x252   :  { %1082 = vmatpush3.msra.mxu0 %v863_v49 }
 0x253   :  { %v576_v58 = vrot.slane %v574_v57, 7  ;;  %v583_v62 = vmul.f32 %v582_v59, %v536_v33  ;;  %v584_v63 = vmul.f32 %v1043_v31, %v582_v59  ;;  %1083 = vmatprep.subr.mxu0 %v1204_v13  ;;  %v855_v57 = vld [vmem:[%s1500_s3 + $0x30] sm:$0xff]  ;;  %v853_v59 = vld [vmem:[%s1500_s3 + $0x20] sm:$0xff] }
 0x254   :  { %1084 = vmatpush3.msra.mxu0 %v862_v50 }
 0x255   :  { %v578_v61 = vsub.f32 %v1250_v3, %v576_v58  ;;  %1085 = vmatprep.subr.mxu0 %v1204_v13  ;;  %v854_v58 = vld [vmem:[%s1500_s3 + $0x28] sm:$0xff] }
 0x256   :  { %1086 = vmatpush3.msra.mxu0 %v861_v51 }
 0x257   :  { %v588_v0 = vrot.slane %v578_v61, %v587_v60  ;;  %1087 = vmatprep.subr.mxu0 %v1204_v13  ;;  %v852_v60 = vld [vmem:[%s1500_s3 + $0x18] sm:$0xff]  ;;  %v851_v61 = vld [vmem:[%s1500_s3 + $0x10] sm:$0xff] }
 0x258   :  { %1088 = vmatpush3.msra.mxu0 %v860_v52 }
 0x259   :  { %v589_v2 = vadd.f32 %v588_v0, %v583_v62  ;;  %v590_v4 = vadd.f32 %v588_v0, %v584_v63  ;;  %1089 = vmatprep.subr.mxu0 %v1204_v13  ;;  %v850_v62 = vld [vmem:[%s1500_s3 + $0x8] sm:$0xff]  ;;  %v849_v63 = vld [vmem:[%s1500_s3] sm:$0xff]  ;;  %s1207_s3 = smov [#allocation7]  }
 0x25a   :  { %1090 = vmatpush3.msra.mxu0 %v859_v53  ;;  %s959_s13 = sshll.u32 %s1207_s3, 4  ;;  %s960_s13 = int_to_ptr.vmem [resolvable:$true] %s959_s13 }
 0x25b   :  { %v591_v5 = vmax.f32 %v589_v2, 0.0  ;;  %v592_v7 = vmax.f32 %v590_v4, 0.0  ;;  %1091 = vmatprep.subr.mxu0 %v1204_v13  ;;  %s1171_s14 = scalar_lea.vmem %s960_s13, 32  ;;  %p1176_p11 = scmp.lt.s32.totalorder %s960_s13, %s960_s13 }
 0x25c   :  { %1092 = vmatpush3.msra.mxu0 %v858_v54  ;;  %p1172_p10 = scmp.ne.s32.totalorder %s960_s13, %s1171_s14  ;;  %p1177_p12 = scmp.lt.s32.totalorder %s1171_s14, %s1171_s14 }
 0x25d   :  { %v595_v10 = vcombine.high %v591_v5, %v591_v5  ;;  %v602_v11 = vrot.slane %v591_v5, %v1273_v21  ;;  %v618_v12 = vrot.slane %v592_v7, %v1273_v21  ;;  %1093 = vmatprep.subr.mxu0 %v1204_v13 }
 0x25e   :  { %1094 = vmatpush3.msra.mxu0 %v857_v55  ;;  %p1178_p13 = por %p1177_p12, %p1176_p11 }
 0x25f   :  { %v609_v15 = vrot.slane %v595_v10, %v1273_v21  ;;  %v619_v16 = vcombine.high %v618_v12, %v618_v12  ;;  %v989_v17 = vrot.slane %v618_v12, 9  ;;  %v610_v18 = vcombine.high %v602_v11, %v602_v11  ;;  %1095 = vmatprep.subr.mxu0 %v1204_v13 }
 0x260   :  { %v985_v19 = vrot.slane %v602_v11, 9  ;;  %1096 = vmatpush3.msra.mxu0 %v856_v56  ;;  %p1179_p0 = pnand %p1178_p13, %p1172_p10 }
 0x261   :  { %v990_v20 = vrot.slane %v619_v16, 9  ;;  %v648_v22 = vmax.f32 %v618_v12, %v989_v17  ;;  %v986_v23 = vrot.slane %v610_v18, 9  ;;  %v987_v28 = vrot.slane %v609_v15, 9  ;;  %1097 = vmatprep.subr.mxu0 %v1204_v13 }
 0x262   :  { %v611_v29 = vcombine.high %v609_v15, %v609_v15  ;;  %v644_v30 = vmax.f32 %v602_v11, %v985_v19  ;;  %1098 = vmatpush3.msra.mxu0 %v855_v57 }
 0x263   :  { %v649_v31 = vmax.f32 %v619_v16, %v990_v20  ;;  %v645_v32 = vmax.f32 %v610_v18, %v986_v23  ;;  %v646_v33 = vmax.f32 %v609_v15, %v987_v28  ;;  %v669_v34 = vrot.slane %v648_v22, %v1266_v6  ;;  %1099 = vmatprep.subr.mxu0 %v1204_v13 }
 0x264   :  { %v988_v24 = vrot.slane %v611_v29, 9  ;;  %v657_v37 = vrot.slane %v644_v30, %v1266_v6  ;;  %1100 = vmatpush3.msra.mxu0 %v854_v58 }
 0x265   :  { %v683_v26 = vrot.slane %v649_v31, %v1266_v6  ;;  %v661_v27 = vrot.slane %v645_v32, %v1266_v6  ;;  %v679_v36 = vrot.slane %v646_v33, %v1266_v6  ;;  %1101 = vmatprep.subr.mxu0 %v1204_v13  ;;  %v821_v32 = vsub.s32 4, %v1244_v1 }
 0x266   :  { %v647_v38 = vmax.f32 %v611_v29, %v988_v24  ;;  %1102 = vmatpush3.msra.mxu0 %v853_v59 }
 0x267   :  { %v685_v25 = vsel %vm357_vm3, %v683_v26, %v669_v34  ;;  %v684_v39 = vsel %vm357_vm3, %v679_v36, %v661_v27  ;;  %v670_v40 = vsel %vm357_vm3, %v661_v27, %v657_v37  ;;  %1103 = vmatprep.subr.mxu0 %v1204_v13  ;;  %v826_v26 = vsub.s32 5, %v1244_v1 }
 0x268   :  { %688 = vrot.lane.b32.xlu0 %v685_v25, %s1206_s2  ;;  %686 = vrot.lane.b32.xlu1 %v684_v39, %s1206_s2  ;;  %v665_v41 = vrot.slane %v647_v38, %v1266_v6 }
 0x269   :  { %1104 = vmatpush3.msra.mxu0 %v852_v60 }
 0x26a   :  { %v671_v42 = vsel %vm357_vm3, %v669_v34, %v665_v41  ;;  %1105 = vmatprep.subr.mxu0 %v1204_v13 }
 0x26b   :  { %1106 = vmatpush3.msra.mxu0 %v851_v61 }
 0x26c   :  { %1107 = vmatprep.subr.mxu0 %v1204_v13 }
 0x26d   :  { %1108 = vmatpush3.msra.mxu0 %v850_v62 }
 0x26e   :  { %1109 = vmatprep.subr.mxu0 %v1204_v13 }
 0x26f   :  { %1110 = vmatpush3.msra.mxu0 %v849_v63 }
 0x2da   :  { %v689_v43 = vpop.permute.xlu0 %688  ;;  %v687_v44 = vpop.permute.xlu1 %686 }
 0x2db   :  { %v693_v45 = vsel %vm547_vm10, %v671_v42, %v689_v43  ;;  %v692_v46 = vsel %vm547_vm10, %v670_v40, %v687_v44 }
 0x2dc   :  { %v712_v47 = vcombine.low %v692_v46, %v693_v45 }
 0x2de   :  { %v719_v48 = vrot.slane %v712_v47, %v1273_v21 }
 0x2e0   :  { %1077 = vmatmul.mubr.f32.vlgmr.msra.gmra.mxu1 %v719_v48  ;;  %v867_v48 = vsub.s32 6, %v1244_v1 }
 0x2e2   :  { %v868_v35 = vrot.slane %v1250_v3, %v867_v48 }
 0x3a0   :  { %v787_v0 = vpop.f32.mrf.mxu1 }
 0x3a1   :  { %v791_v2 = vmul.f32 %v787_v0, %v787_v0  ;;  %v793_v4 = vsel %vm792_vm12, %v787_v0, 0.0 }
 0x3a2   :  { %v794_v5 = vrot.slane %v793_v4, 4  ;;  %v1078_v7 = vpop.f32.mrf.mxu1 }
 0x3a3   :  { %v800_v8 = vsel %vm792_vm12, %v791_v2, 0.0 }
 0x3a4   :  { %v795_v9 = vadd.f32 %v794_v5, %v793_v4  ;;  %v801_v10 = vrot.slane %v800_v8, 4 }
 0x3a6   :  { %v796_v11 = vrot.slane %v795_v9, 2  ;;  %v802_v12 = vadd.f32 %v801_v10, %v800_v8 }
 0x3a8   :  { %v797_v14 = vadd.f32 %v796_v11, %v795_v9  ;;  %v803_v15 = vrot.slane %v802_v12, 2 }
 0x3aa   :  { %v798_v16 = vrot.slane %v797_v14, 1  ;;  %v804_v17 = vadd.f32 %v803_v15, %v802_v12 }
 0x3ac   :  { %v799_v18 = vadd.f32 %v798_v16, %v797_v14  ;;  %v805_v19 = vrot.slane %v804_v17, 1 }
 0x3ae   :  { %v806_v20 = vadd.f32 %v805_v19, %v804_v17  ;;  %v807_v13 = vmul.f32 0.25, %v799_v18 }
 0x3b0   :  { %v808_v22 = vmul.f32 0.25, %v806_v20  ;;  %v809_v23 = vmul.f32 %v807_v13, %v807_v13 }
 0x3b2   :  { %v810_v28 = vsub.f32 %v808_v22, %v809_v23 }
 0x3b4   :  { %v811_v29 = vadd.f32 1e-05, %v810_v28 }
 0x3b6   :  { %1129 = vrsqrt.f32 %v811_v29 }
 0x3c3   :  { %v1130_v30 = vpop.eup %1129 }
 0x3c4   :  { %v813_v31 = vmul.f32 %v1130_v30, %v1250_v3 }
 0x3c6   :  { %v814_v33 = vmul.f32 %v813_v31, %v807_v13  ;;  %v822_v24 = vrot.slane %v813_v31, %v821_v32 }
 0x3c8   :  { %v816_v34 = vrot.slane %v814_v33, 7  ;;  %v823_v36 = vmul.f32 %v822_v24, %v787_v0 }
 0x3ca   :  { %v818_v27 = vsub.f32 %v1250_v3, %v816_v34 }
 0x3cc   :  { %v827_v37 = vrot.slane %v818_v27, %v826_v26 }
 0x3ce   :  { %v828_v38 = vadd.f32 %v827_v37, %v823_v36 }
 0x3d0   :  { %v829_v25 = vmax.f32 %v828_v38, 0.0 }
 0x3d2   :  { %v837_v39 = vrot.slane %v829_v25, %v1273_v21 }
 0x3d4   :  { %v838_v40 = vcombine.high %v837_v39, %v837_v39  ;;  %v991_v41 = vrot.slane %v837_v39, 9 }
 0x3d6   :  { %v992_v42 = vrot.slane %v838_v40, 9  ;;  %v847_v43 = vmax.f32 %v837_v39, %v991_v41 }
 0x3d8   :  { %v848_v44 = vmax.f32 %v838_v40, %v992_v42  ;;  %v874_v45 = vrot.slane %v847_v43, %v1266_v6 }
 0x3da   :  { %v878_v46 = vrot.slane %v848_v44, %v1266_v6 }
 0x3dc   :  { %v879_v47 = vsel %vm357_vm3, %v878_v46, %v874_v45 }
 0x3dd   :  { %1112 = vmatmul.mubr.f32.vlgmr.msra.gmra.mxu0 %v879_v47 }
 0x49d   :  { %v947_v49 = vpop.f32.mrf.mxu0 }
 0x49e   :  { %v948_v21 = vadd.f32 %v947_v49, %v868_v35 }
 0x49f   :  { %v1113_v50 = vpop.f32.mrf.mxu0 }
 0x4a0   :  { %952 = vst.msk [vmem:[#allocation7] sm:$0x3] %vm951_vm13, %v948_v21 }
 0x4a1   :  { %1182 = shalt.err (!%p1179_p0)
}
 0x4a2   :  { %962 = dma.vmem_to_hbm [thread:$0]  %s960_s13, 32, %s1502_s5, [#allocation4]  }
 0x4a3   :  { %1195 = dma.done.wait [#allocation4], 32  }
 0x4a4   :  { %1196 = vsyncadd [#allocation4], 4294967264 }
 0x4a5   :  { %966 = vsyncpa [#allocation3], 1 }
 0x4a6   :  { %967 = vsyncpa [#allocation6], 1 }
 0x4a7   :  { %968 = vsyncpa [#allocation4], 1 }

</bundles_post_ra>
